<compile_context>
chip_gen: v5e
topology: v5e:2x2
jax: 0.10.0
libtpu: 0.0.40
codegen_flags: <defaults>
</compile_context>

<pallas_src>
import jax
import jax.numpy as jnp
from jax import lax
from jax.experimental import pallas as pl
from jax.experimental.pallas import tpu as pltpu


# --------------------------------- kernel ------------------------------------
def _bottleneck_kernel(x_ref, w1_ref, w2_ref, w3_ref, b_ref, out_ref):
    # x_ref:   (NB, H, W*Cin)                lane-dense chunk of NB images
    # w1_ref:  (W*Cin, W*Cout + W*Cmid)      fused [shortcut | conv1], BN-scaled
    # w2_ref:  (W*Cmid, 3*SW)                banded 3x3 conv (dy slabs), scaled
    # w3_ref:  (W*Cmid, W*Cout)              block-diag 1x1 conv, BN-scaled
    # b_ref:   (3, BW)  rows = [b1 | b2 | b3 + b_shortcut]  (tiled per pixel)
    # out_ref: (NB, H, W*Cout)               lane-dense output
    NB, H, WCin = x_ref.shape
    NBH = NB * H
    WCout = out_ref.shape[2]                 # packed output / shortcut width
    WCmid = w3_ref.shape[0]                  # packed mid-activation width
    SW = w2_ref.shape[1] // 3                # 128-aligned width of each dy slab
    cdt = w1_ref.dtype                       # matmul operand dtype (bf16/f32)

    def silu(v):                             # divide goes to the EUP slot
        return v * pl.reciprocal(1.0 + jnp.exp(-v), approx=True)

    # ---- fused conv1 + 1x1 shortcut: one matmul over the whole chunk --------
    xf = x_ref[...].reshape(NBH, WCin)       # leading-dim merge only (free)
    h = jnp.dot(xf, w1_ref[...], preferred_element_type=jnp.float32)
    sc = h[:, :WCout]                        # scaled shortcut (vreg-aligned)
    h1 = silu(h[:, WCout:WCout + WCmid] + b_ref[0:1, :WCmid])

    # ---- conv2 (3x3, pad=1): one banded matmul + two tiny row-shift matmuls -
    hw = jnp.dot(h1.astype(cdt), w2_ref[...],
                 preferred_element_type=jnp.float32)      # (NBH, 3*SW)
    # hw[r, dy*SW : dy*SW+WCmid] is the horizontal dy-tap of input row r;
    # output row r gathers rows r-1 / r / r+1, zero outside each image.
    r = lax.broadcasted_iota(jnp.int32, (NBH, NBH), 0)
    k = lax.broadcasted_iota(jnp.int32, (NBH, NBH), 1)
    shift_dn = ((k == r - 1) & (r % H != 0)).astype(jnp.float32)      # row r-1
    shift_up = ((k == r + 1) & (r % H != H - 1)).astype(jnp.float32)  # row r+1
    h2 = (jnp.dot(shift_dn, hw[:, 0:WCmid],
                  preferred_element_type=jnp.float32)
          + hw[:, SW:SW + WCmid]
          + jnp.dot(shift_up, hw[:, 2 * SW:2 * SW + WCmid],
                    preferred_element_type=jnp.float32))
    h2 = silu(h2 + b_ref[1:2, :WCmid])

    # ---- conv3 (1x1) + merged bn3/shortcut-BN bias, residual, final SiLU ----
    h3 = jnp.dot(h2.astype(cdt), w3_ref[...],
                 preferred_element_type=jnp.float32)
    out = silu(h3 + b_ref[2:3, :WCout] + sc)
    out_ref[...] = out.reshape(NB, H, WCout).astype(out_ref.dtype)


# ------------------------------ wrapper side ----------------------------------
def _pack_params(p, W, compute_dtype):
    """Fold BN scales into lane-packed weight matrices (wrapper-side, free in
    XLA): block-diagonal for the 1x1 convs, banded for the 3x3 conv."""
    Cmid = p["w2"].shape[2]
    Cout = p["w3"].shape[1]
    WCmid, WCout = W * Cmid, W * Cout
    SW = ((WCmid + 127) // 128) * 128            # 128-lane-aligned slab width
    eyeW = jnp.eye(W, dtype=jnp.float32)

    # fused [shortcut | conv1]; shortcut first so both result slices are
    # 128-lane aligned.  BN scales folded into the columns.
    W1 = jnp.concatenate([jnp.kron(eyeW, p["ws"] * p["ss"]),
                          jnp.kron(eyeW, p["w1"] * p["s1"])], axis=1)

    # 3x3 conv with horizontal zero-padding folded into the band structure:
    # slab_dy[wi*Cmid+ci, wo*Cmid+co] = w2[dy,dx,ci,co]*s2[co] for wi=wo+dx-1.
    slabs = []
    for dy in range(3):
        slab = sum(jnp.kron(jnp.eye(W, W, k=1 - dx, dtype=jnp.float32),
                            p["w2"][dy, dx] * p["s2"]) for dx in range(3))
        slabs.append(jnp.pad(slab, ((0, 0), (0, SW - WCmid))))
    W2 = jnp.concatenate(slabs, axis=1)          # (W*Cmid, 3*SW)

    W3 = jnp.kron(eyeW, p["w3"] * p["s3"])       # (W*Cmid, W*Cout)

    # biases: one small (3, BW) array = [b1 | b2 | b3 + b_shortcut]
    BW = max(WCmid, WCout)
    def _row(v, n):
        return jnp.pad(jnp.tile(v, (1, W)), ((0, 0), (0, BW - n)))
    bias = jnp.concatenate([_row(p["b1"], WCmid),
                            _row(p["b2"], WCmid),
                            _row(p["b3"] + p["bs"], WCout)],
                           axis=0).astype(jnp.float32)

    return (W1.astype(compute_dtype), W2.astype(compute_dtype),
            W3.astype(compute_dtype), bias)


def _num_tensorcores_per_chip():
    """2 only on 2-TC parts (v7x); v5e/v6e are 1 TC -> single grid step."""
    try:
        kind = jax.devices()[0].device_kind.lower()
    except Exception:
        return 1
    return 2 if ("v7" in kind or "7x" in kind) else 1


def residual_bottleneck_pallas(x_nhwc, p, compute_dtype=jnp.bfloat16,
                               out_dtype=jnp.float32, chunks=None):
    """x_nhwc: (N, H, W, Cin) f32.  Returns (N, H, W, Cout) in out_dtype
    (pass jnp.bfloat16 to halve the output writeback if the consumer allows)."""
    N, H, W, Cin = x_nhwc.shape
    Cout = p["w3"].shape[1]
    WCin, WCout = W * Cin, W * Cout

    W1, W2, W3, bias = _pack_params(p, W, compute_dtype)

    if chunks is None:
        chunks = 2 if (_num_tensorcores_per_chip() >= 2
                       and N % 2 == 0 and N >= 2) else 1
    NB = N // chunks

    # lane-dense packing of the input (wrapper reshape = free layout plumbing)
    x_packed = x_nhwc.reshape(N, H, WCin).astype(compute_dtype)

    full = lambda a: pl.BlockSpec(a.shape, lambda n: (0,) * a.ndim)
    grid_spec = pltpu.PrefetchScalarGridSpec(
        num_scalar_prefetch=0,
        grid=(chunks,),
        in_specs=[
            pl.BlockSpec((NB, H, WCin), lambda n: (n, 0, 0)),   # x (packed)
            full(W1), full(W2), full(W3), full(bias),
        ],
        out_specs=pl.BlockSpec((NB, H, WCout), lambda n: (n, 0, 0)),
    )

    out_packed = pl.pallas_call(
        _bottleneck_kernel,
        out_shape=jax.ShapeDtypeStruct((N, H, WCout), out_dtype),
        grid_spec=grid_spec,
        compiler_params=pltpu.CompilerParams(
            dimension_semantics=("parallel",)),
    )(x_packed, W1, W2, W3, bias)

    return out_packed.reshape(N, H, W, Cout)


# ---------------------------- pure-JAX reference ------------------------------
def residual_bottleneck_ref(x_nhwc, p, compute_dtype=jnp.bfloat16):
    """Reference with the same numeric policy as the kernel (BN scales folded
    into bf16 weights, f32 accumulation, f32 epilogue)."""
    silu = lambda v: v * jax.nn.sigmoid(v)
    cdt = compute_dtype
    xc = x_nhwc.astype(cdt)

    w1 = (p["w1"] * p["s1"]).astype(cdt)
    h1 = silu(jnp.einsum("nhwc,cd->nhwd", xc, w1,
                         preferred_element_type=jnp.float32) + p["b1"])

    w2 = (p["w2"] * p["s2"]).astype(cdt)
    h2 = lax.conv_general_dilated(
        h1.astype(cdt), w2, window_strides=(1, 1), padding="SAME",
        dimension_numbers=("NHWC", "HWIO", "NHWC"),
        preferred_element_type=jnp.float32)
    h2 = silu(h2 + p["b2"])

    w3 = (p["w3"] * p["s3"]).astype(cdt)
    h3 = jnp.einsum("nhwc,cd->nhwd", h2.astype(cdt), w3,
                    preferred_element_type=jnp.float32)

    ws = (p["ws"] * p["ss"]).astype(cdt)
    sc = jnp.einsum("nhwc,cd->nhwd", xc, ws,
                    preferred_element_type=jnp.float32)
    return silu(h3 + p["b3"] + p["bs"] + sc)


def fold_bn(gamma, beta, mean, var, eps=0.001):
    scale = gamma / jnp.sqrt(var + eps)
    bias = beta - mean * scale
    return scale.reshape(1, -1), bias.reshape(1, -1)


def make_params(key, Cin, Cmid, Cout):
    ks = jax.random.split(key, 20)
    p = {}
    p["w1"] = 0.2 * jax.random.normal(ks[0], (Cin, Cmid), jnp.float32)
    p["w2"] = 0.2 * jax.random.normal(ks[1], (3, 3, Cmid, Cmid), jnp.float32)
    p["w3"] = 0.2 * jax.random.normal(ks[2], (Cmid, Cout), jnp.float32)
    p["ws"] = 0.2 * jax.random.normal(ks[3], (Cin, Cout), jnp.float32)

    def bn(kg, kb, km, kv, C):
        gamma = jax.random.uniform(kg, (C,), jnp.float32, 0.8, 1.2)
        beta = 0.1 * jax.random.normal(kb, (C,), jnp.float32)
        mean = 0.1 * jax.random.normal(km, (C,), jnp.float32)
        var = jax.random.uniform(kv, (C,), jnp.float32, 0.5, 1.5)
        return fold_bn(gamma, beta, mean, var)

    p["s1"], p["b1"] = bn(ks[4], ks[5], ks[6], ks[7], Cmid)
    p["s2"], p["b2"] = bn(ks[8], ks[9], ks[10], ks[11], Cmid)
    p["s3"], p["b3"] = bn(ks[12], ks[13], ks[14], ks[15], Cout)
    p["ss"], p["bs"] = bn(ks[16], ks[17], ks[18], ks[19], Cout)
    return p


if __name__ == "__main__":
    # module config: in_channels=4, out_channels=8 -> mid_channels=4
    N, Cin, Cout, H, W = 2, 4, 8, 16, 16
    Cmid = Cout // 2

    key = jax.random.PRNGKey(0)
    kx, kp = jax.random.split(key)
    x_nchw = jax.random.normal(kx, (N, Cin, H, W), jnp.float32)  # PyTorch NCHW
    params = make_params(kp, Cin, Cmid, Cout)

    x_nhwc = jnp.transpose(x_nchw, (0, 2, 3, 1))                 # TPU layout

    out_nhwc = residual_bottleneck_pallas(x_nhwc, params)
    out_nhwc = jax.block_until_ready(out_nhwc)
    out_nchw = jnp.transpose(out_nhwc, (0, 3, 1, 2))             # back to NCHW

    ref_nhwc = residual_bottleneck_ref(x_nhwc, params)
    assert out_nchw.shape == (N, Cout, H, W)
    # tolerance covers accumulation-order differences of the packed matmuls
    # and the approx-reciprocal SiLU
    assert jnp.allclose(out_nhwc, ref_nhwc, rtol=1e-2, atol=1e-2), \
        "mismatch vs reference"

    print("KERNEL_OK")
</pallas_src>

<mosaic_0001>
module attributes {stable_mosaic.version = 11 : i64} {
  func.func @_bottleneck_kernel(%arg0: i32, %arg1: memref<2x16x64xbf16, #tpu.memory_space<vmem>>, %arg2: memref<64x192xbf16, #tpu.memory_space<vmem>>, %arg3: memref<64x384xbf16, #tpu.memory_space<vmem>>, %arg4: memref<64x128xbf16, #tpu.memory_space<vmem>>, %arg5: memref<3x128xf32, #tpu.memory_space<vmem>>, %arg6: memref<2x16x128xf32, #tpu.memory_space<vmem>>) attributes {dimension_semantics = [#tpu.dimension_semantics<parallel>], iteration_bounds = array<i64: 1>, scalar_prefetch = 0 : i64, scratch_operands = 0 : i64, tpu.core_type = #tpu.core_type<tc>, window_params = [{transform_indices = @transform_0, window_bounds = array<i64: 2, 16, 64>}, {pipeline_mode = #tpu.pipeline_mode<synchronous>, transform_indices = @transform_1, window_bounds = array<i64: 64, 192>}, {pipeline_mode = #tpu.pipeline_mode<synchronous>, transform_indices = @transform_2, window_bounds = array<i64: 64, 384>}, {pipeline_mode = #tpu.pipeline_mode<synchronous>, transform_indices = @transform_3, window_bounds = array<i64: 64, 128>}, {pipeline_mode = #tpu.pipeline_mode<synchronous>, transform_indices = @transform_4, window_bounds = array<i64: 3, 128>}, {transform_indices = @transform_5, window_bounds = array<i64: 2, 16, 128>}]} {
    %c0 = arith.constant 0 : index
    %c0_0 = arith.constant 0 : index
    %c0_1 = arith.constant 0 : index
    %0 = vector.load %arg1[%c0, %c0_0, %c0_1] : memref<2x16x64xbf16, #tpu.memory_space<vmem>>, vector<2x16x64xbf16>
    %1 = vector.shape_cast %0 : vector<2x16x64xbf16> to vector<32x64xbf16>
    %c0_2 = arith.constant 0 : index
    %c0_3 = arith.constant 0 : index
    %2 = vector.load %arg2[%c0_2, %c0_3] : memref<64x192xbf16, #tpu.memory_space<vmem>>, vector<64x192xbf16>
    %cst = arith.constant dense<0.000000e+00> : vector<32x192xf32>
    %3 = tpu.matmul %1, %2, %cst {dimension_numbers = #tpu.dot_dimension_numbers<[1], [0], [0], [1], [0, 0, 1, 1], [], []>} : vector<32x64xbf16>, vector<64x192xbf16>, vector<32x192xf32> -> vector<32x192xf32>
    %4 = vector.extract_strided_slice %3 {offsets = [0, 0], sizes = [32, 128], strides = [1, 1]} : vector<32x192xf32> to vector<32x128xf32>
    %5 = vector.extract_strided_slice %3 {offsets = [0, 128], sizes = [32, 64], strides = [1, 1]} : vector<32x192xf32> to vector<32x64xf32>
    %c0_4 = arith.constant 0 : index
    %c0_5 = arith.constant 0 : index
    %6 = vector.load %arg5[%c0_4, %c0_5] : memref<3x128xf32, #tpu.memory_space<vmem>>, vector<1x64xf32>
    %7 = vector.broadcast %6 : vector<1x64xf32> to vector<32x64xf32>
    %8 = arith.addf %5, %7 : vector<32x64xf32>
    %cst_6 = arith.constant 0.000000e+00 : f32
    %9 = vector.broadcast %cst_6 : f32 to vector<32x64xf32>
    %10 = arith.subf %9, %8 : vector<32x64xf32>
    %11 = math.exp %10 : vector<32x64xf32>
    %cst_7 = arith.constant 1.000000e+00 : f32
    %12 = vector.broadcast %cst_7 : f32 to vector<32x64xf32>
    %13 = arith.addf %12, %11 : vector<32x64xf32>
    %14 = tpu.reciprocal %13 {approx = true} : vector<32x64xf32> -> vector<32x64xf32>
    %15 = arith.mulf %8, %14 : vector<32x64xf32>
    %16 = arith.truncf %15 : vector<32x64xf32> to vector<32x64xbf16>
    %c0_8 = arith.constant 0 : index
    %c0_9 = arith.constant 0 : index
    %17 = vector.load %arg3[%c0_8, %c0_9] : memref<64x384xbf16, #tpu.memory_space<vmem>>, vector<64x384xbf16>
    %cst_10 = arith.constant dense<0.000000e+00> : vector<32x384xf32>
    %18 = tpu.matmul %16, %17, %cst_10 {dimension_numbers = #tpu.dot_dimension_numbers<[1], [0], [0], [1], [0, 0, 1, 1], [], []>} : vector<32x64xbf16>, vector<64x384xbf16>, vector<32x384xf32> -> vector<32x384xf32>
    %19 = tpu.iota {dimensions = array<i32: 0>} : vector<32x32xi32>
    %20 = tpu.iota {dimensions = array<i32: 1>} : vector<32x32xi32>
    %c1_i32 = arith.constant 1 : i32
    %21 = vector.broadcast %c1_i32 : i32 to vector<32x32xi32>
    %22 = arith.subi %19, %21 : vector<32x32xi32>
    %23 = arith.cmpi eq, %20, %22 : vector<32x32xi32>
    %c16_i32 = arith.constant 16 : i32
    %c0_i32 = arith.constant 0 : i32
    %24 = arith.cmpi eq, %c16_i32, %c0_i32 : i32
    %c1_i32_11 = arith.constant 1 : i32
    %25 = arith.select %24, %c1_i32_11, %c16_i32 : i32
    %26 = vector.broadcast %25 : i32 to vector<32x32xi32>
    %27 = arith.remsi %19, %26 : vector<32x32xi32>
    %c0_i32_12 = arith.constant 0 : i32
    %28 = vector.broadcast %c0_i32_12 : i32 to vector<32x32xi32>
    %29 = arith.cmpi ne, %27, %28 : vector<32x32xi32>
    %c0_i32_13 = arith.constant 0 : i32
    %30 = vector.broadcast %c0_i32_13 : i32 to vector<32x32xi32>
    %31 = arith.cmpi slt, %27, %30 : vector<32x32xi32>
    %c0_i32_14 = arith.constant 0 : i32
    %32 = arith.cmpi slt, %25, %c0_i32_14 : i32
    %33 = vector.broadcast %32 : i1 to vector<32x32xi1>
    %34 = vector.broadcast %33 : vector<32x32xi1> to vector<32x32xi1>
    %35 = arith.xori %31, %34 : vector<32x32xi1>
    %36 = arith.andi %35, %29 : vector<32x32xi1>
    %37 = vector.broadcast %25 : i32 to vector<32x32xi32>
    %38 = arith.addi %27, %37 : vector<32x32xi32>
    %39 = arith.select %36, %38, %27 : vector<32x32xi1>, vector<32x32xi32>
    %c0_i32_15 = arith.constant 0 : i32
    %40 = vector.broadcast %c0_i32_15 : i32 to vector<32x32xi32>
    %41 = arith.cmpi ne, %39, %40 : vector<32x32xi32>
    %42 = arith.andi %23, %41 : vector<32x32xi1>
    %43 = arith.extui %42 : vector<32x32xi1> to vector<32x32xi32>
    %44 = arith.sitofp %43 : vector<32x32xi32> to vector<32x32xf32>
    %c1_i32_16 = arith.constant 1 : i32
    %45 = vector.broadcast %c1_i32_16 : i32 to vector<32x32xi32>
    %46 = arith.addi %19, %45 : vector<32x32xi32>
    %47 = arith.cmpi eq, %20, %46 : vector<32x32xi32>
    %c16_i32_17 = arith.constant 16 : i32
    %c0_i32_18 = arith.constant 0 : i32
    %48 = arith.cmpi eq, %c16_i32_17, %c0_i32_18 : i32
    %c1_i32_19 = arith.constant 1 : i32
    %49 = arith.select %48, %c1_i32_19, %c16_i32_17 : i32
    %50 = vector.broadcast %49 : i32 to vector<32x32xi32>
    %51 = arith.remsi %19, %50 : vector<32x32xi32>
    %c0_i32_20 = arith.constant 0 : i32
    %52 = vector.broadcast %c0_i32_20 : i32 to vector<32x32xi32>
    %53 = arith.cmpi ne, %51, %52 : vector<32x32xi32>
    %c0_i32_21 = arith.constant 0 : i32
    %54 = vector.broadcast %c0_i32_21 : i32 to vector<32x32xi32>
    %55 = arith.cmpi slt, %51, %54 : vector<32x32xi32>
    %c0_i32_22 = arith.constant 0 : i32
    %56 = arith.cmpi slt, %49, %c0_i32_22 : i32
    %57 = vector.broadcast %56 : i1 to vector<32x32xi1>
    %58 = vector.broadcast %57 : vector<32x32xi1> to vector<32x32xi1>
    %59 = arith.xori %55, %58 : vector<32x32xi1>
    %60 = arith.andi %59, %53 : vector<32x32xi1>
    %61 = vector.broadcast %49 : i32 to vector<32x32xi32>
    %62 = arith.addi %51, %61 : vector<32x32xi32>
    %63 = arith.select %60, %62, %51 : vector<32x32xi1>, vector<32x32xi32>
    %c15_i32 = arith.constant 15 : i32
    %64 = vector.broadcast %c15_i32 : i32 to vector<32x32xi32>
    %65 = arith.cmpi ne, %63, %64 : vector<32x32xi32>
    %66 = arith.andi %47, %65 : vector<32x32xi1>
    %67 = arith.extui %66 : vector<32x32xi1> to vector<32x32xi32>
    %68 = arith.sitofp %67 : vector<32x32xi32> to vector<32x32xf32>
    %69 = vector.extract_strided_slice %18 {offsets = [0, 0], sizes = [32, 64], strides = [1, 1]} : vector<32x384xf32> to vector<32x64xf32>
    %cst_23 = arith.constant dense<0.000000e+00> : vector<32x64xf32>
    %70 = tpu.matmul %44, %69, %cst_23 {dimension_numbers = #tpu.dot_dimension_numbers<[1], [0], [0], [1], [0, 0, 1, 1], [], []>} : vector<32x32xf32>, vector<32x64xf32>, vector<32x64xf32> -> vector<32x64xf32>
    %71 = vector.extract_strided_slice %18 {offsets = [0, 128], sizes = [32, 64], strides = [1, 1]} : vector<32x384xf32> to vector<32x64xf32>
    %72 = arith.addf %70, %71 : vector<32x64xf32>
    %73 = vector.extract_strided_slice %18 {offsets = [0, 256], sizes = [32, 64], strides = [1, 1]} : vector<32x384xf32> to vector<32x64xf32>
    %cst_24 = arith.constant dense<0.000000e+00> : vector<32x64xf32>
    %74 = tpu.matmul %68, %73, %cst_24 {dimension_numbers = #tpu.dot_dimension_numbers<[1], [0], [0], [1], [0, 0, 1, 1], [], []>} : vector<32x32xf32>, vector<32x64xf32>, vector<32x64xf32> -> vector<32x64xf32>
    %75 = arith.addf %72, %74 : vector<32x64xf32>
    %c1 = arith.constant 1 : index
    %c0_25 = arith.constant 0 : index
    %76 = vector.load %arg5[%c1, %c0_25] : memref<3x128xf32, #tpu.memory_space<vmem>>, vector<1x64xf32>
    %77 = vector.broadcast %76 : vector<1x64xf32> to vector<32x64xf32>
    %78 = arith.addf %75, %77 : vector<32x64xf32>
    %cst_26 = arith.constant 0.000000e+00 : f32
    %79 = vector.broadcast %cst_26 : f32 to vector<32x64xf32>
    %80 = arith.subf %79, %78 : vector<32x64xf32>
    %81 = math.exp %80 : vector<32x64xf32>
    %cst_27 = arith.constant 1.000000e+00 : f32
    %82 = vector.broadcast %cst_27 : f32 to vector<32x64xf32>
    %83 = arith.addf %82, %81 : vector<32x64xf32>
    %84 = tpu.reciprocal %83 {approx = true} : vector<32x64xf32> -> vector<32x64xf32>
    %85 = arith.mulf %78, %84 : vector<32x64xf32>
    %86 = arith.truncf %85 : vector<32x64xf32> to vector<32x64xbf16>
    %c0_28 = arith.constant 0 : index
    %c0_29 = arith.constant 0 : index
    %87 = vector.load %arg4[%c0_28, %c0_29] : memref<64x128xbf16, #tpu.memory_space<vmem>>, vector<64x128xbf16>
    %cst_30 = arith.constant dense<0.000000e+00> : vector<32x128xf32>
    %88 = tpu.matmul %86, %87, %cst_30 {dimension_numbers = #tpu.dot_dimension_numbers<[1], [0], [0], [1], [0, 0, 1, 1], [], []>} : vector<32x64xbf16>, vector<64x128xbf16>, vector<32x128xf32> -> vector<32x128xf32>
    %c2 = arith.constant 2 : index
    %c0_31 = arith.constant 0 : index
    %89 = vector.load %arg5[%c2, %c0_31] : memref<3x128xf32, #tpu.memory_space<vmem>>, vector<1x128xf32>
    %90 = vector.broadcast %89 : vector<1x128xf32> to vector<32x128xf32>
    %91 = arith.addf %88, %90 : vector<32x128xf32>
    %92 = arith.addf %91, %4 : vector<32x128xf32>
    %cst_32 = arith.constant 0.000000e+00 : f32
    %93 = vector.broadcast %cst_32 : f32 to vector<32x128xf32>
    %94 = arith.subf %93, %92 : vector<32x128xf32>
    %95 = math.exp %94 : vector<32x128xf32>
    %cst_33 = arith.constant 1.000000e+00 : f32
    %96 = vector.broadcast %cst_33 : f32 to vector<32x128xf32>
    %97 = arith.addf %96, %95 : vector<32x128xf32>
    %98 = tpu.reciprocal %97 {approx = true} : vector<32x128xf32> -> vector<32x128xf32>
    %99 = arith.mulf %92, %98 : vector<32x128xf32>
    %100 = vector.shape_cast %99 : vector<32x128xf32> to vector<2x16x128xf32>
    %c0_34 = arith.constant 0 : index
    %c0_35 = arith.constant 0 : index
    %c0_36 = arith.constant 0 : index
    %101 = vector.load %arg6[%c0_34, %c0_35, %c0_36] : memref<2x16x128xf32, #tpu.memory_space<vmem>>, vector<2x16x128xf32>
    tpu.vector_store %arg6[%c0_34, %c0_35, %c0_36], %100 {strides = array<i32>} : memref<2x16x128xf32, #tpu.memory_space<vmem>>, vector<2x16x128xf32>,
    return
  }
  func.func @transform_0(%arg0: i32) -> (i32, i32, i32) {
    %c0_i32 = arith.constant 0 : i32
    %c0_i32_0 = arith.constant 0 : i32
    %c0_i32_1 = arith.constant 0 : i32
    return %arg0, %c0_i32, %c0_i32_0 : i32, i32, i32
  }
  func.func @transform_1(%arg0: i32) -> (i32, i32) {
    %c0_i32 = arith.constant 0 : i32
    %c0_i32_0 = arith.constant 0 : i32
    %c0_i32_1 = arith.constant 0 : i32
    return %c0_i32, %c0_i32_0 : i32, i32
  }
  func.func @transform_2(%arg0: i32) -> (i32, i32) {
    %c0_i32 = arith.constant 0 : i32
    %c0_i32_0 = arith.constant 0 : i32
    %c0_i32_1 = arith.constant 0 : i32
    return %c0_i32, %c0_i32_0 : i32, i32
  }
  func.func @transform_3(%arg0: i32) -> (i32, i32) {
    %c0_i32 = arith.constant 0 : i32
    %c0_i32_0 = arith.constant 0 : i32
    %c0_i32_1 = arith.constant 0 : i32
    return %c0_i32, %c0_i32_0 : i32, i32
  }
  func.func @transform_4(%arg0: i32) -> (i32, i32) {
    %c0_i32 = arith.constant 0 : i32
    %c0_i32_0 = arith.constant 0 : i32
    %c0_i32_1 = arith.constant 0 : i32
    return %c0_i32, %c0_i32_0 : i32, i32
  }
  func.func @transform_5(%arg0: i32) -> (i32, i32, i32) {
    %c0_i32 = arith.constant 0 : i32
    %c0_i32_0 = arith.constant 0 : i32
    %c0_i32_1 = arith.constant 0 : i32
    return %arg0, %c0_i32, %c0_i32_0 : i32, i32, i32
  }
}

</mosaic_0001>

<bundles_post_ra>
// kernel: tpu_custom_call.1
= control target key start
LH: loop header
LB: loop body
LE: loop exit
PB: predicated region body
PF: predicated region fallthrough
CT: control target
= control target key end

     0   :  { %10 = vsyncpa [#allocation3], 0  ;;  %s1191_s0 = inlined_call_operand.hbm [shape: bf16[2,16,64], index: 0, kind: input, shape index: {}]   ;;  %s1192_s1 = inlined_call_operand.hbm [shape: bf16[64,192], index: 1, kind: input, shape index: {}]   ;;  %s1193_s2 = inlined_call_operand.hbm [shape: bf16[64,384], index: 2, kind: input, shape index: {}]   ;;  %s1194_s3 = inlined_call_operand.hbm [shape: bf16[64,128], index: 3, kind: input, shape index: {}]   ;;  %s1195_s4 = inlined_call_operand.hbm [shape: f32[3,128], index: 4, kind: input, shape index: {}]   ;;  %s1196_s5 = inlined_call_operand.hbm [shape: f32[2,16,128], index: 5, kind: output, shape index: {}]  }
   0x1   :  { %11 = vsyncpa [#allocation6], 0 }
   0x2   :  { %12 = vsyncpa [#allocation9], 0  ;;  %s31_s20 = sshll.u32 %s1192_s1, 4  ;;  %s32_s20 = int_to_ptr.hbm [resolvable:$true] %s31_s20 }
   0x3   :  { %13 = vsyncpa [#allocation4], 0  ;;  %s1092_s21 = smov [#allocation5]   ;;  %s1093_s23 = smov 128  }
   0x4   :  { %s33_s22 = sshll.u32 %s1092_s21, 4  ;;  %s1094_s24 = smov 8   ;;  %s34_s22 = int_to_ptr.vmem [resolvable:$true] %s33_s22 }
   0x5   :  { %39 = dma.hbm_to_vmem [thread:$0]  %s32_s20, 1024, %s34_s22, [#allocation6], %s1093_s23, %s1093_s23, %s1094_s24  }
   0x6   :  { %s57_s27 = sshll.u32 %s1194_s3, 4  ;;  %s1095_s28 = smov [#allocation8]   ;;  %s58_s27 = int_to_ptr.hbm [resolvable:$true] %s57_s27 }
   0x7   :  { %s59_s29 = sshll.u32 %s1095_s28, 4  ;;  %s18_s6 = sshll.u32 %s1191_s0, 4  ;;  %s60_s29 = int_to_ptr.vmem [resolvable:$true] %s59_s29  ;;  %s19_s6 = int_to_ptr.hbm [resolvable:$true] %s18_s6 }
   0x8   :  { %s1096_s7 = smov 64   ;;  %s1097_s8 = smov 4  }
   0x9   :  { %65 = dma.hbm_to_vmem [thread:$0]  %s58_s27, 512, %s60_s29, [#allocation9], %s1096_s7, %s1096_s7, %s1097_s8  }
   0xa   :  { %s44_s11 = sshll.u32 %s1193_s2, 4  ;;  %s1098_s12 = smov [#allocation2]   ;;  %s45_s11 = int_to_ptr.hbm [resolvable:$true] %s44_s11 }
   0xb   :  { %s20_s13 = sshll.u32 %s1098_s12, 4  ;;  %s1099_s3 = smov [#allocation7]   ;;  %s21_s13 = int_to_ptr.vmem [resolvable:$true] %s20_s13 }
   0xc   :  { %26 = dma.hbm_to_vmem [thread:$0]  %s19_s6, 256, %s21_s13, [#allocation3], %s1096_s7, %s1096_s7, %s1097_s8  }
   0xd   :  { %s46_s14 = sshll.u32 %s1099_s3, 4  ;;  %s1100_s15 = smov 192   ;;  %s47_s14 = int_to_ptr.vmem [resolvable:$true] %s46_s14 }
   0xe   :  { %s1101_s16 = smov 12   ;;  %s71_s18 = sshll.u32 %s1195_s4, 4  ;;  %s72_s18 = int_to_ptr.hbm [resolvable:$true] %s71_s18 }
   0xf   :  { %52 = dma.hbm_to_vmem [thread:$0]  %s45_s11, 1536, %s47_s14, [#allocation6], %s1100_s15, %s1100_s15, %s1101_s16  }
  0x10   :  { %s1102_s19 = smov [#allocation10]  }
  0x11   :  { %s73_s20 = sshll.u32 %s1102_s19, 4  ;;  %s74_s20 = int_to_ptr.vmem [resolvable:$true] %s73_s20 }
  0x12   :  { %76 = dma.hbm_to_vmem [thread:$0]  %s72_s18, 64, %s74_s20, [#allocation9]  }
  0x13   :  { %1084 = dma.done.wait [#allocation3], 256  }
  0x14   :  { %1085 = vsyncadd [#allocation3], 4294967040 }
  0x15   :  { %1086 = dma.done.wait [#allocation6], 2560  }
  0x16   :  { %1087 = vsyncadd [#allocation6], 4294964736 }
  0x17   :  { %1088 = dma.done.wait [#allocation9], 576  }
  0x18   :  { %1089 = vsyncadd [#allocation9], 4294966720  ;;  %v858_v0 = vld [vmem:[#allocation5 + $0x34] sm:$0xf]  ;;  %v750_v1 = vld [vmem:[#allocation5 + $0x38] sm:$0xf0] }
  0x19   :  { %v856_v2 = vld [vmem:[#allocation5 + $0x24] sm:$0xf]  ;;  %v753_v3 = vor.u32 %v858_v0, %v750_v1  ;;  %v742_v4 = vld [vmem:[#allocation5 + $0x28] sm:$0xf0]  ;;  %v854_v6 = vld [vmem:[#allocation5 + $0x14] sm:$0xf] }
  0x1a   :  { %v745_v5 = vor.u32 %v856_v2, %v742_v4  ;;  %v748_v7 = vld [vmem:[#allocation5 + $0x30] sm:$0xf]  ;;  %v859_v8 = vld [vmem:[#allocation5 + $0x34] sm:$0xf0]  ;;  %v734_v9 = vld [vmem:[#allocation5 + $0x18] sm:$0xf0] }
  0x1b   :  { %190 = vmatpush.bf16.msra.mxu1 %v753_v3  ;;  %v749_v10 = vor.u32 %v859_v8, %v748_v7  ;;  %v740_v11 = vld [vmem:[#allocation5 + $0x20] sm:$0xf]  ;;  %v857_v12 = vld [vmem:[#allocation5 + $0x24] sm:$0xf0]  ;;  %v737_v14 = vor.u32 %v854_v6, %v734_v9  ;;  %v732_v15 = vld [vmem:[#allocation5 + $0x10] sm:$0xf] }
  0x1c   :  { %v741_v13 = vor.u32 %v857_v12, %v740_v11  ;;  %v855_v16 = vld [vmem:[#allocation5 + $0x14] sm:$0xf0]  ;;  %v852_v17 = vld [vmem:[#allocation5 + $0x4] sm:$0xf]  ;;  %v726_v18 = vld [vmem:[#allocation5 + $0x8] sm:$0xf0] }
  0x1d   :  { %171 = vmatpush.bf16.msra.mxu0 %v749_v10  ;;  %v733_v19 = vor.u32 %v855_v16, %v732_v15  ;;  %v729_v20 = vor.u32 %v852_v17, %v726_v18  ;;  %v724_v21 = vld [vmem:[#allocation5] sm:$0xf]  ;;  %v853_v22 = vld [vmem:[#allocation5 + $0x4] sm:$0xf0]  ;;  %v850_v23 = vld [vmem:[#allocation2] sm:$0xff]  ;;  %vm160_vm0 = vcmask 523264  }
  0x1e   :  { %v725_v24 = vor.u32 %v853_v22, %v724_v21  ;;  %v851_v25 = vld [vmem:[#allocation2 + $0x8] sm:$0xff]  ;;  %v796_v26 = vld [vmem:[#allocation7 + $0x48] sm:$0xf]  ;;  %v870_v27 = vld [vmem:[#allocation7 + $0x50] sm:$0xf0]  ;;  %vm483_vm4 = vcmask 261120  }
  0x1f   :  { %191 = vmatpush.bf16.msra.mxu1 %v745_v5  ;;  %v869_v28 = vld [vmem:[#allocation7 + $0x4c] sm:$0xf]  ;;  %v797_v29 = vor.u32 %v870_v27, %v796_v26  ;;  %v798_v30 = vld [vmem:[#allocation7 + $0x54] sm:$0xf0]  ;;  %v804_v31 = vld [vmem:[#allocation7 + $0x50] sm:$0xf] }
  0x20   :  { %v871_v32 = vld [vmem:[#allocation7 + $0x58] sm:$0xf0]  ;;  %v801_v33 = vor.u32 %v869_v28, %v798_v30  ;;  %v784_v35 = vld [vmem:[#allocation7 + $0x30] sm:$0xf]  ;;  %v866_v37 = vld [vmem:[#allocation7 + $0x34] sm:$0xf] }
  0x21   :  { %172 = vmatpush.bf16.msra.mxu0 %v741_v13  ;;  %v805_v34 = vor.u32 %v871_v32, %v804_v31  ;;  %327 = vmatpush.bf16.msra.mxu2 %v797_v29  ;;  %v867_v36 = vld [vmem:[#allocation7 + $0x38] sm:$0xf0]  ;;  %v786_v39 = vld [vmem:[#allocation7 + $0x3c] sm:$0xf0]  ;;  %v792_v40 = vld [vmem:[#allocation7 + $0x38] sm:$0xf] }
  0x22   :  { %346 = vmatpush.bf16.msra.mxu3 %v801_v33  ;;  %v785_v38 = vor.u32 %v867_v36, %v784_v35  ;;  %v868_v41 = vld [vmem:[#allocation7 + $0x40] sm:$0xf0]  ;;  %v789_v42 = vor.u32 %v866_v37, %v786_v39  ;;  %v772_v44 = vld [vmem:[#allocation7 + $0x18] sm:$0xf]  ;;  %v863_v46 = vld [vmem:[#allocation7 + $0x1c] sm:$0xf] }
  0x23   :  { %192 = vmatpush.bf16.msra.mxu1 %v737_v14  ;;  %v793_v43 = vor.u32 %v868_v41, %v792_v40  ;;  %v864_v45 = vld [vmem:[#allocation7 + $0x20] sm:$0xf0]  ;;  %v774_v48 = vld [vmem:[#allocation7 + $0x24] sm:$0xf0]  ;;  %v780_v49 = vld [vmem:[#allocation7 + $0x20] sm:$0xf]  ;;  %v380_v41 = vlaneseq }
  0x24   :  { %v773_v47 = vor.u32 %v864_v45, %v772_v44  ;;  %v865_v50 = vld [vmem:[#allocation7 + $0x28] sm:$0xf0]  ;;  %v777_v51 = vor.u32 %v863_v46, %v774_v48  ;;  %v889_v53 = vld [vmem:[#allocation10] ss:$0 sm:$0xff]  ;;  %v860_v56 = vld [vmem:[#allocation7 + $0x4] sm:$0xf] }
  0x25   :  { %173 = vmatpush.bf16.msra.mxu0 %v733_v19  ;;  %328 = vmatpush.bf16.msra.mxu2 %v785_v38  ;;  %v781_v52 = vor.u32 %v865_v50, %v780_v49  ;;  %v760_v54 = vld [vmem:[#allocation7] sm:$0xf]  ;;  %v861_v55 = vld [vmem:[#allocation7 + $0x8] sm:$0xf0]  ;;  %v762_v58 = vld [vmem:[#allocation7 + $0xc] sm:$0xf0] }
  0x26   :  { %347 = vmatpush.bf16.msra.mxu3 %v789_v42  ;;  %v761_v57 = vor.u32 %v861_v55, %v760_v54  ;;  %v768_v59 = vld [vmem:[#allocation7 + $0x8] sm:$0xf]  ;;  %v862_v60 = vld [vmem:[#allocation7 + $0x10] sm:$0xf0]  ;;  %v765_v61 = vor.u32 %v860_v56, %v762_v58  ;;  %v386_v45 = vand.u32 127, %v380_v41  ;;  %v1103_v54 = vmov 0.0  }
  0x27   :  { %193 = vmatpush.bf16.msra.mxu1 %v729_v20  ;;  %v769_v62 = vor.u32 %v862_v60, %v768_v59  ;;  %s1104_s2 = smov [#allocation11]   ;;  %s699_s25 = sshll.u32 %s1196_s5, 4  ;;  %s700_s25 = int_to_ptr.hbm [resolvable:$true] %s699_s25 }
  0x28   :  { %s697_s4 = sshll.u32 %s1104_s2, 4  ;;  %s698_s4 = int_to_ptr.vmem [resolvable:$true] %s697_s4 }
  0x29   :  { %174 = vmatpush.bf16.msra.mxu0 %v725_v24  ;;  %329 = vmatpush.bf16.msra.mxu2 %v773_v47 }
  0x2a   :  { %756 = vmatmul.msk.bf16.vlgmr.msra.gmra.mxu1 %vm160_vm0, %v850_v23  ;;  %348 = vmatpush.bf16.msra.mxu3 %v777_v51 }
  0x2c   :  { %754 = vmatmul.msk.bf16.vlgmr.msra.gmra.mxu0 %vm160_vm0, %v850_v23 }
  0x2d   :  { %365 = vmatpush.bf16.msrb.mxu0 %v805_v34  ;;  %330 = vmatpush.bf16.msra.mxu2 %v761_v57 }
  0x2e   :  { %349 = vmatpush.bf16.msra.mxu3 %v765_v61 }
  0x31   :  { %366 = vmatpush.bf16.msrb.mxu0 %v793_v43  ;;  %v381_v43 = vshrl.u32 %v380_v41, 7 }
  0x33   :  { %v459_v46 = vadd.s32 1, %v381_v43  ;;  %v382_v47 = vadd.s32 8, %v381_v43  ;;  %v812_v49 = vadd.s32 4294967295, %v381_v43  ;;  %v399_v50 = vand.u32 15, %v381_v43 }
  0x34   :  { %v383_v57 = vadd.s32 16, %v381_v43  ;;  %v384_v61 = vadd.s32 24, %v381_v43 }
  0x35   :  { %367 = vmatpush.bf16.msrb.mxu0 %v781_v52  ;;  %vm463_vm1 = vcmp.eq.s32.totalorder %v386_v45, %v459_v46  ;;  %v406_v51 = vand.u32 15, %v382_v47  ;;  %v460_v52 = vadd.s32 1, %v382_v47  ;;  %vm391_vm2 = vcmp.eq.s32.totalorder %v386_v45, %v812_v49 }
  0x36   :  { %vm443_vm3 = vcmp.ne.s32.totalorder %v399_v50, 0  ;;  %v820_v55 = vsel %vm463_vm1, 1.0, %v1103_v54  ;;  %v813_v58 = vadd.s32 4294967295, %v382_v47  ;;  %v461_v60 = vadd.s32 1, %v383_v57 }
  0x37   :  { %vm447_vm5 = vmand %vm391_vm2, %vm443_vm3  ;;  %vm464_vm6 = vcmp.eq.s32.totalorder %v386_v45, %v460_v52  ;;  %vm468_vm7 = vcmp.ne.s32.totalorder %v406_v51, 15 }
  0x38   :  { %v816_v56 = vsel %vm447_vm5, 1.0, %v1103_v54  ;;  %vm472_vm8 = vmand %vm464_vm6, %vm468_vm7  ;;  %vm392_vm9 = vcmp.eq.s32.totalorder %v386_v45, %v813_v58  ;;  %vm465_vm10 = vcmp.eq.s32.totalorder %v386_v45, %v461_v60 }
  0x39   :  { %368 = vmatpush.bf16.msrb.mxu0 %v769_v62  ;;  %v821_v59 = vsel %vm472_vm8, 1.0, %v1103_v54  ;;  %v814_v62 = vadd.s32 4294967295, %v383_v57 }
  0x3a   :  { %757 = vmatmul.msk.bf16.gmra.mxu1 %vm160_vm0, %v851_v25 }
  0x3b   :  { %vm393_vm11 = vcmp.eq.s32.totalorder %v386_v45, %v814_v62 }
  0x3c   :  { %755 = vmatmul.msk.bf16.gmra.mxu0 %vm160_vm0, %v851_v25 }
  0xa7   :  { %v195_v63 = vpop.f32.mrf.mxu1 }
  0xa8   :  { %v207_v0 = vadd.f32 %v889_v53, %v195_v63  ;;  %v413_v63 = vand.u32 15, %v383_v57 }
  0xa9   :  { %v1163_v33 = vpop.f32.mrf.mxu0 }
  0xaa   :  { %v211_v1 = vsub.f32 0.0, %v207_v0  ;;  %vm445_vm12 = vcmp.ne.s32.totalorder %v413_v63, 0 }
  0xab   :  { %vm449_vm13 = vmand %vm393_vm11, %vm445_vm12 }
  0xac   :  { %v215_v2 = vmul.f32 1.442695, %v211_v1  ;;  %v420_v1 = vand.u32 15, %v384_v61 }
  0xae   :  { %892 = vpow2.f32 %v215_v2  ;;  %v462_v2 = vadd.s32 1, %v384_v61  ;;  %vm470_vm15 = vcmp.ne.s32.totalorder %v420_v1, 15 }
  0xaf   :  { %v197_v3 = vpop.f32.mrf.mxu1 }
  0xb0   :  { %v208_v4 = vadd.f32 %v889_v53, %v197_v3  ;;  %v822_v3 = vsel %vm465_vm10, 1.0, %v1103_v54  ;;  %vm466_vm14 = vcmp.eq.s32.totalorder %v386_v45, %v462_v2 }
  0xb1   :  { %v1165_v34 = vpop.f32.mrf.mxu0  ;;  %vm474_vm1 = vmand %vm466_vm14, %vm470_vm15 }
  0xb2   :  { %v212_v5 = vsub.f32 0.0, %v208_v4 }
  0xb4   :  { %v217_v6 = vmul.f32 1.442695, %v212_v5  ;;  %v893_v7 = vpop.eup %892  ;;  %v815_v5 = vadd.s32 4294967295, %v384_v61 }
  0xb5   :  { %v223_v10 = vadd.f32 1.0, %v893_v7 }
  0xb6   :  { %894 = vpow2.f32 %v217_v6  ;;  %v823_v6 = vsel %vm474_vm1, 1.0, %v1103_v54  ;;  %vm394_vm2 = vcmp.eq.s32.totalorder %v386_v45, %v815_v5 }
  0xb7   :  { %v200_v8 = vpop.f32.mrf.mxu1  ;;  %896 = vrcp.f32 %v223_v10  ;;  %v819_v7 = vsel %vm394_vm2, 1.0, %v1103_v54  ;;  %v874_v10 = vld [vmem:[#allocation8 + $0x10] sm:$0xff] }
  0xb8   :  { %v209_v9 = vadd.f32 %v889_v53, %v200_v8  ;;  %v875_v8 = vld [vmem:[#allocation8 + $0x18] sm:$0xff] }
  0xb9   :  { %v1167_v35 = vpop.f32.mrf.mxu0  ;;  %646 = vmatpush.bf16.msrb.mxu3 %v875_v8 }
  0xba   :  { %v213_v11 = vsub.f32 0.0, %v209_v9 }
  0xbc   :  { %v895_v12 = vpop.eup %894  ;;  %v219_v13 = vmul.f32 1.442695, %v213_v11  ;;  %v873_v11 = vld [vmem:[#allocation8 + $0x8] sm:$0xff] }
  0xbd   :  { %v224_v14 = vadd.f32 1.0, %v895_v12  ;;  %v897_v18 = vpop.eup %896  ;;  %647 = vmatpush.bf16.msrb.mxu3 %v874_v10 }
  0xbe   :  { %v231_v22 = vmul.f32 %v897_v18, %v207_v0  ;;  %v817_v0 = vsel %vm392_vm9, 1.0, %v1103_v54 }
  0xbf   :  { %898 = vrcp.f32 %v224_v14  ;;  %v202_v15 = vpop.f32.mrf.mxu1 }
  0xc0   :  { %900 = vpow2.f32 %v219_v13  ;;  %v210_v16 = vadd.f32 %v889_v53, %v202_v15  ;;  %v890_v15 = vld [vmem:[#allocation10 + $0x1] ss:$0 sm:$0xff] }
  0xc1   :  { %v1169_v36 = vpop.f32.mrf.mxu0  ;;  %648 = vmatpush.bf16.msrb.mxu3 %v873_v11 }
  0xc2   :  { %v214_v17 = vsub.f32 0.0, %v210_v16 }
  0xc4   :  { %v221_v19 = vmul.f32 1.442695, %v214_v17  ;;  %v872_v17 = vld [vmem:[#allocation8] sm:$0xff] }
  0xc5   :  { %v899_v20 = vpop.eup %898  ;;  %649 = vmatpush.bf16.msrb.mxu3 %v872_v17 }
  0xc6   :  { %v901_v21 = vpop.eup %900  ;;  %v232_v23 = vmul.f32 %v899_v20, %v208_v4  ;;  %902 = vpow2.f32 %v221_v19  ;;  %v818_v4 = vsel %vm449_vm13, 1.0, %v1103_v54 }
  0xc7   :  { %v225_v25 = vadd.f32 1.0, %v901_v21 }
  0xc8   :  { %v235_v24 = vpack.c.bf16 %v232_v23, %v231_v22 }
  0xc9   :  { %904 = vrcp.f32 %v225_v25 }
  0xca   :  { %806 = vmatmul.msk.bf16.vlgmr.msra.gmra.mxu2 %vm160_vm0, %v235_v24  ;;  %808 = vmatmul.msk.bf16.vlgmr.msra.gmra.mxu3 %vm160_vm0, %v235_v24 }
  0xcb   :  { %810 = vmatmul.msk.bf16.vlgmr.msrb.gmra.mxu0 %vm160_vm0, %v235_v24 }
  0xcc   :  { %v903_v26 = vpop.eup %902 }
  0xcd   :  { %v226_v27 = vadd.f32 1.0, %v903_v26 }
  0xcf   :  { %906 = vrcp.f32 %v226_v27  ;;  %v905_v28 = vpop.eup %904 }
  0xd0   :  { %v233_v30 = vmul.f32 %v905_v28, %v209_v9 }
  0xd5   :  { %v907_v29 = vpop.eup %906 }
  0xd6   :  { %v234_v31 = vmul.f32 %v907_v29, %v210_v16 }
  0xd8   :  { %v236_v32 = vpack.c.bf16 %v234_v31, %v233_v30 }
  0xda   :  { %807 = vmatmul.msk.bf16.gmra.mxu2 %vm160_vm0, %v236_v32  ;;  %809 = vmatmul.msk.bf16.gmra.mxu3 %vm160_vm0, %v236_v32 }
  0xdb   :  { %811 = vmatmul.msk.bf16.gmra.mxu0 %vm160_vm0, %v236_v32 }
 0x148   :  { %v370_v37 = vpop.f32.mrf.mxu0 }
 0x14d   :  { %v332_v38 = vpop.f32.mrf.mxu2  ;;  %v351_v9 = vpop.f32.mrf.mxu3 }
 0x150   :  { %v372_v39 = vpop.f32.mrf.mxu0 }
 0x155   :  { %v334_v40 = vpop.f32.mrf.mxu2  ;;  %v353_v18 = vpop.f32.mrf.mxu3 }
 0x158   :  { %v375_v42 = vpop.f32.mrf.mxu0 }
 0x15d   :  { %v337_v44 = vpop.f32.mrf.mxu2  ;;  %v356_v27 = vpop.f32.mrf.mxu3 }
 0x160   :  { %v377_v48 = vpop.f32.mrf.mxu0 }
 0x161   :  { %549 = vmatpush.msrb.mxu2 %v377_v48 }
 0x163   :  { %550 = vmatpush.msrb.mxu2 %v375_v42 }
 0x165   :  { %551 = vmatpush.msrb.mxu2 %v372_v39  ;;  %v339_v53 = vpop.f32.mrf.mxu2  ;;  %v358_v42 = vpop.f32.mrf.mxu3 }
 0x166   :  { %508 = vmatpush.msrb.mxu1 %v339_v53 }
 0x167   :  { %552 = vmatpush.msrb.mxu2 %v370_v37 }
 0x168   :  { %509 = vmatpush.msrb.mxu1 %v337_v44  ;;  %828 = vmatmul.msk.f32.vlgmr.msrb.gmra.mxu2 %vm483_vm4, %v820_v55 }
 0x16a   :  { %510 = vmatpush.msrb.mxu1 %v334_v40 }
 0x16c   :  { %511 = vmatpush.msrb.mxu1 %v332_v38 }
 0x16d   :  { %824 = vmatmul.msk.f32.vlgmr.msrb.gmra.mxu1 %vm483_vm4, %v816_v56 }
 0x170   :  { %829 = vmatmul.msk.f32.gmra.mxu2 %vm483_vm4, %v821_v59 }
 0x175   :  { %825 = vmatmul.msk.f32.gmra.mxu1 %vm483_vm4, %v817_v0 }
 0x178   :  { %830 = vmatmul.msk.f32.gmra.mxu2 %vm483_vm4, %v822_v3  ;;  %v891_v3 = vld [vmem:[#allocation10 + $0x2] ss:$0 sm:$0xff] }
 0x17d   :  { %826 = vmatmul.msk.f32.gmra.mxu1 %vm483_vm4, %v818_v4 }
 0x180   :  { %831 = vmatmul.msk.f32.gmra.mxu2 %vm483_vm4, %v823_v6 }
 0x185   :  { %827 = vmatmul.msk.f32.gmra.mxu1 %vm483_vm4, %v819_v7 }
 0x1ea   :  { %v513_v12 = vpop.f32.mrf.mxu1 }
 0x1eb   :  { %v514_v13 = vadd.f32 %v513_v12, %v351_v9  ;;  %v554_v14 = vpop.f32.mrf.mxu2 }
 0x1ed   :  { %v566_v16 = vadd.f32 %v554_v14, %v514_v13 }
 0x1ef   :  { %v572_v19 = vadd.f32 %v890_v15, %v566_v16 }
 0x1f1   :  { %v576_v20 = vsub.f32 0.0, %v572_v19 }
 0x1f2   :  { %v516_v21 = vpop.f32.mrf.mxu1 }
 0x1f3   :  { %v580_v22 = vmul.f32 1.442695, %v576_v20  ;;  %v517_v23 = vadd.f32 %v516_v21, %v353_v18  ;;  %v557_v24 = vpop.f32.mrf.mxu2 }
 0x1f5   :  { %v567_v25 = vadd.f32 %v557_v24, %v517_v23  ;;  %908 = vpow2.f32 %v580_v22 }
 0x1f7   :  { %v573_v26 = vadd.f32 %v890_v15, %v567_v25 }
 0x1f9   :  { %v577_v28 = vsub.f32 0.0, %v573_v26 }
 0x1fa   :  { %v519_v29 = vpop.f32.mrf.mxu1 }
 0x1fb   :  { %v582_v30 = vmul.f32 1.442695, %v577_v28  ;;  %v520_v31 = vadd.f32 %v519_v29, %v356_v27  ;;  %v560_v32 = vpop.f32.mrf.mxu2  ;;  %v909_v37 = vpop.eup %908 }
 0x1fc   :  { %v588_v40 = vadd.f32 1.0, %v909_v37 }
 0x1fd   :  { %910 = vpow2.f32 %v582_v30  ;;  %v568_v38 = vadd.f32 %v560_v32, %v520_v31 }
 0x1fe   :  { %912 = vrcp.f32 %v588_v40 }
 0x1ff   :  { %v574_v39 = vadd.f32 %v890_v15, %v568_v38 }
 0x201   :  { %v578_v41 = vsub.f32 0.0, %v574_v39 }
 0x202   :  { %v522_v43 = vpop.f32.mrf.mxu1 }
 0x203   :  { %v911_v44 = vpop.eup %910  ;;  %v584_v45 = vmul.f32 1.442695, %v578_v41  ;;  %v523_v46 = vadd.f32 %v522_v43, %v358_v42  ;;  %v563_v47 = vpop.f32.mrf.mxu2 }
 0x204   :  { %v589_v48 = vadd.f32 1.0, %v911_v44  ;;  %v913_v52 = vpop.eup %912 }
 0x205   :  { %v569_v49 = vadd.f32 %v563_v47, %v523_v46  ;;  %v596_v56 = vmul.f32 %v913_v52, %v572_v19 }
 0x206   :  { %914 = vrcp.f32 %v589_v48 }
 0x207   :  { %916 = vpow2.f32 %v584_v45  ;;  %v575_v50 = vadd.f32 %v890_v15, %v569_v49 }
 0x209   :  { %v579_v51 = vsub.f32 0.0, %v575_v50 }
 0x20b   :  { %v586_v53 = vmul.f32 1.442695, %v579_v51 }
 0x20c   :  { %v915_v54 = vpop.eup %914 }
 0x20d   :  { %v917_v55 = vpop.eup %916  ;;  %v597_v57 = vmul.f32 %v915_v54, %v573_v26  ;;  %918 = vpow2.f32 %v586_v53 }
 0x20e   :  { %v590_v59 = vadd.f32 1.0, %v917_v55 }
 0x20f   :  { %v600_v58 = vpack.c.bf16 %v597_v57, %v596_v56 }
 0x210   :  { %920 = vrcp.f32 %v590_v59 }
 0x211   :  { %848 = vmatmul.msk.bf16.vlgmr.msrb.gmra.mxu3 %vm160_vm0, %v600_v58 }
 0x213   :  { %v919_v60 = vpop.eup %918 }
 0x214   :  { %v591_v61 = vadd.f32 1.0, %v919_v60 }
 0x216   :  { %922 = vrcp.f32 %v591_v61  ;;  %v921_v62 = vpop.eup %920 }
 0x217   :  { %v598_v0 = vmul.f32 %v921_v62, %v574_v39 }
 0x21c   :  { %v923_v63 = vpop.eup %922 }
 0x21d   :  { %v599_v1 = vmul.f32 %v923_v63, %v575_v50 }
 0x21f   :  { %v601_v2 = vpack.c.bf16 %v599_v1, %v598_v0 }
 0x221   :  { %849 = vmatmul.msk.bf16.gmra.mxu3 %vm160_vm0, %v601_v2 }
 0x294   :  { %v651_v4 = vpop.f32.mrf.mxu3 }
 0x295   :  { %v652_v5 = vadd.f32 %v891_v3, %v651_v4 }
 0x297   :  { %v661_v6 = vadd.f32 %v652_v5, %v1163_v33 }
 0x299   :  { %v665_v7 = vsub.f32 0.0, %v661_v6 }
 0x29b   :  { %v669_v8 = vmul.f32 1.442695, %v665_v7 }
 0x29c   :  { %v653_v9 = vpop.f32.mrf.mxu3 }
 0x29d   :  { %924 = vpow2.f32 %v669_v8  ;;  %v654_v10 = vadd.f32 %v891_v3, %v653_v9 }
 0x29f   :  { %v662_v11 = vadd.f32 %v654_v10, %v1165_v34 }
 0x2a1   :  { %v666_v12 = vsub.f32 0.0, %v662_v11 }
 0x2a3   :  { %v925_v13 = vpop.eup %924  ;;  %v671_v14 = vmul.f32 1.442695, %v666_v12 }
 0x2a4   :  { %v677_v15 = vadd.f32 1.0, %v925_v13  ;;  %v656_v16 = vpop.f32.mrf.mxu3 }
 0x2a5   :  { %926 = vpow2.f32 %v671_v14  ;;  %v657_v17 = vadd.f32 %v891_v3, %v656_v16 }
 0x2a6   :  { %928 = vrcp.f32 %v677_v15 }
 0x2a7   :  { %v663_v18 = vadd.f32 %v657_v17, %v1167_v35 }
 0x2a9   :  { %v667_v19 = vsub.f32 0.0, %v663_v18 }
 0x2ab   :  { %v927_v20 = vpop.eup %926  ;;  %v673_v33 = vmul.f32 1.442695, %v667_v19 }
 0x2ac   :  { %v929_v21 = vpop.eup %928  ;;  %v678_v22 = vadd.f32 1.0, %v927_v20  ;;  %v658_v23 = vpop.f32.mrf.mxu3 }
 0x2ad   :  { %v685_v24 = vmul.f32 %v929_v21, %v661_v6  ;;  %930 = vpow2.f32 %v673_v33  ;;  %v659_v25 = vadd.f32 %v891_v3, %v658_v23 }
 0x2ae   :  { %932 = vrcp.f32 %v678_v22 }
 0x2af   :  { %689 = vst [vmem:[#allocation11] sm:$0xff] %v685_v24  ;;  %v664_v34 = vadd.f32 %v659_v25, %v1169_v36 }
 0x2b1   :  { %v668_v26 = vsub.f32 0.0, %v664_v34 }
 0x2b3   :  { %v931_v27 = vpop.eup %930  ;;  %v675_v28 = vmul.f32 1.442695, %v668_v26 }
 0x2b4   :  { %v933_v29 = vpop.eup %932  ;;  %v679_v30 = vadd.f32 1.0, %v931_v27 }
 0x2b5   :  { %v686_v31 = vmul.f32 %v933_v29, %v662_v11  ;;  %934 = vpow2.f32 %v675_v28 }
 0x2b6   :  { %936 = vrcp.f32 %v679_v30 }
 0x2b7   :  { %690 = vst [vmem:[#allocation11 + $0x8] sm:$0xff] %v686_v31 }
 0x2bb   :  { %v935_v35 = vpop.eup %934 }
 0x2bc   :  { %v937_v32 = vpop.eup %936  ;;  %v680_v37 = vadd.f32 1.0, %v935_v35 }
 0x2bd   :  { %v687_v38 = vmul.f32 %v937_v32, %v663_v18 }
 0x2be   :  { %938 = vrcp.f32 %v680_v37 }
 0x2bf   :  { %691 = vst [vmem:[#allocation11 + $0x10] sm:$0xff] %v687_v38 }
 0x2c4   :  { %v939_v36 = vpop.eup %938 }
 0x2c5   :  { %v688_v39 = vmul.f32 %v939_v36, %v664_v34 }
 0x2c7   :  { %692 = vst [vmem:[#allocation11 + $0x18] sm:$0xff] %v688_v39 }
 0x2c8   :  { %705 = dma.vmem_to_hbm [thread:$0]  %s698_s4, 512, %s700_s25, [#allocation4], %s1093_s23, %s1093_s23, %s1094_s24  }
 0x2c9   :  { %1090 = dma.done.wait [#allocation4], 512  }
 0x2ca   :  { %1091 = vsyncadd [#allocation4], 4294966784 }
 0x2cb   :  { %710 = vsyncpa [#allocation3], 1 }
 0x2cc   :  { %711 = vsyncpa [#allocation6], 1 }
 0x2cd   :  { %712 = vsyncpa [#allocation9], 1 }
 0x2ce   :  { %713 = vsyncpa [#allocation4], 1 }

</bundles_post_ra>
